<compile_context>
chip_gen: v7x
topology: tpu7x:2x2x1
jax: 0.10.0
libtpu: 0.0.40
codegen_flags: <defaults>
</compile_context>

<pallas_src>
import jax
import jax.numpy as jnp
from jax.experimental import pallas as pl
from jax.experimental.pallas import tpu as pltpu


_DEFAULT_MIN_KERNEL_BYTES = 4 * 1024 * 1024      # below this: metadata reshape only
_DEFAULT_TARGET_CHUNK_BYTES = 4 * 1024 * 1024    # aim for >= a few MiB per DMA
_MAX_CHUNKS_PER_CORE = 8                         # max in-flight DMAs per core


def _make_flatten_kernel(rows_per_prog: int, n_chunks: int, chunk_rows: int):
    """Each grid program DMAs its `rows_per_prog` rows HBM->HBM in
    `n_chunks` chunks; all chunk DMAs are started before any wait."""

    def kernel(x_hbm_ref, o_hbm_ref, sem):
        pid = pl.program_id(0)
        base = pl.multiple_of(pid * rows_per_prog, rows_per_prog)
        copies = []
        for c in range(n_chunks):            # static unroll: n_chunks descriptors
            start = base + c * chunk_rows
            cp = pltpu.make_async_copy(
                x_hbm_ref.at[pl.ds(start, chunk_rows), :],
                o_hbm_ref.at[pl.ds(start, chunk_rows), :],
                sem.at[c],
            )
            cp.start()                        # issue, keep in flight
            copies.append(cp)
        for cp in copies:                     # wait only after all are in flight
            cp.wait()

    return kernel


def _choose_chunking(rows: int, row_bytes: int, n_programs: int,
                     target_chunk_bytes: int, max_chunks: int):
    rows_per_prog = rows // n_programs
    prog_bytes = rows_per_prog * row_bytes
    desired = int(max(1, min(max_chunks,
                             prog_bytes // max(1, target_chunk_bytes))))
    n_chunks = 1
    for k in range(desired, 0, -1):           # largest divisor of rows_per_prog <= desired
        if rows_per_prog % k == 0:
            n_chunks = k
            break
    return rows_per_prog, n_chunks, rows_per_prog // n_chunks


def flatten_layer(x, *, materialize: bool = True,
                  min_kernel_bytes: int = _DEFAULT_MIN_KERNEL_BYTES,
                  target_chunk_bytes: int = _DEFAULT_TARGET_CHUNK_BYTES):
    """Pallas equivalent of FlattenLayer.forward: (B, ...) -> (B, prod(...)).

    materialize=False (or tensors below `min_kernel_bytes`): metadata-only
    reshape — flatten costs nothing, matching torch .view aliasing semantics.
    materialize=True on large tensors: fresh flattened buffer produced by a
    chunked, multi-in-flight HBM->HBM DMA inside a Pallas kernel.
    """
    b = x.shape[0]
    f = 1
    for d in x.shape[1:]:
        f *= int(d)

    # Row-major flatten: identical element order to torch.Tensor.view(B, -1);
    # metadata-only for contiguous inputs.
    x2d = jnp.reshape(x, (b, f))

    itemsize = jnp.dtype(x.dtype).itemsize
    total_bytes = b * f * itemsize
    if (not materialize) or b == 0 or f == 0 or total_bytes < min_kernel_bytes:
        return x2d

    # Two programs -> two TensorCores on v7x; single-TC chips run them
    # sequentially (negligible per-step overhead at these sizes).
    n_programs = 2 if (b >= 2 and b % 2 == 0) else 1
    rows_per_prog, n_chunks, chunk_rows = _choose_chunking(
        b, f * itemsize, n_programs, target_chunk_bytes, _MAX_CHUNKS_PER_CORE)

    kernel = _make_flatten_kernel(rows_per_prog, n_chunks, chunk_rows)

    return pl.pallas_call(
        kernel,
        out_shape=jax.ShapeDtypeStruct((b, f), x.dtype),
        grid=(n_programs,),
        in_specs=[pl.BlockSpec(memory_space=pl.ANY)],   # raw HBM ref, no auto-DMA
        out_specs=pl.BlockSpec(memory_space=pl.ANY),    # raw HBM ref, DMA destination
        scratch_shapes=[pltpu.SemaphoreType.DMA((n_chunks,))],
        compiler_params=pltpu.CompilerParams(
            dimension_semantics=("parallel",)),
        cost_estimate=pl.CostEstimate(
            flops=0, transcendentals=0, bytes_accessed=2 * total_bytes),
    )(x2d)


if __name__ == "__main__":
    key = jax.random.PRNGKey(0)

    # NCHW input, small shapes: batch=2, channels=4, spatial=16x16.
    x = jax.random.normal(key, (2, 4, 16, 16), dtype=jnp.float32)
    y_ref = jnp.reshape(x, (x.shape[0], -1))

    # Pallas DMA path.  min_kernel_bytes=0 forces the kernel even at this
    # tiny size so it is exercised; real callers keep the default threshold
    # and small tensors fall back to the free metadata reshape.
    y = jax.block_until_ready(
        flatten_layer(x, materialize=True, min_kernel_bytes=0))
    assert y.shape == (2, 4 * 16 * 16), y.shape
    assert y.dtype == x.dtype
    assert bool(jnp.array_equal(y, y_ref))

    # Multi-chunk / two-program path: batch=8 with a tiny target chunk size
    # so several DMAs are in flight per program (4 chunks x 2 programs).
    x2 = jax.random.normal(jax.random.PRNGKey(0), (8, 4, 16, 16),
                           dtype=jnp.float32)
    y2_ref = jnp.reshape(x2, (8, -1))
    y2 = jax.block_until_ready(
        flatten_layer(x2, materialize=True, min_kernel_bytes=0,
                      target_chunk_bytes=1))
    assert y2.shape == (8, 4 * 16 * 16), y2.shape
    assert bool(jnp.array_equal(y2, y2_ref))

    # Fast path (no kernel, metadata-only reshape).
    y_fast = jax.block_until_ready(flatten_layer(x, materialize=False))
    assert bool(jnp.array_equal(y_fast, y_ref))

    print("KERNEL_OK")
</pallas_src>

<mosaic_0001>
module attributes {stable_mosaic.version = 11 : i64} {
  func.func @kernel(%arg0: i32, %arg1: memref<2x1024xf32, #tpu.memory_space<any>>, %arg2: memref<2x1024xf32, #tpu.memory_space<any>>, %arg3: memref<1x!tpu.dma_semaphore, #tpu.memory_space<semaphore_mem>>) attributes {dimension_semantics = [#tpu.dimension_semantics<parallel>], iteration_bounds = array<i64: 2>, scalar_prefetch = 0 : i64, scratch_operands = 1 : i64, tpu.core_type = #tpu.core_type<tc>, window_params = [{}, {}]} {
    %c1_i32 = arith.constant 1 : i32
    %0 = arith.muli %arg0, %c1_i32 : i32
    %1 = tpu.assume_multiple %0, 1 : i32
    %c0_i32 = arith.constant 0 : i32
    %2 = arith.addi %1, %c0_i32 : i32
    %c0_i32_0 = arith.constant 0 : i32
    %c0_i32_1 = arith.constant 0 : i32
    %3 = tpu.memref_slice %arg1[%2, %c0_i32_1] : memref<2x1024xf32, #tpu.memory_space<any>> -> memref<1x1024xf32, #tpu.memory_space<any>>
    %c0_i32_2 = arith.constant 0 : i32
    %4 = tpu.memref_slice %arg2[%2, %c0_i32_2] : memref<2x1024xf32, #tpu.memory_space<any>> -> memref<1x1024xf32, #tpu.memory_space<any>>
    %5 = tpu.memref_slice %arg3[%c0_i32_0] : memref<1x!tpu.dma_semaphore, #tpu.memory_space<semaphore_mem>> -> memref<1x!tpu.dma_semaphore, #tpu.memory_space<semaphore_mem>>
    %6 = tpu.memref_squeeze %5 : memref<1x!tpu.dma_semaphore, #tpu.memory_space<semaphore_mem>> -> memref<!tpu.dma_semaphore, #tpu.memory_space<semaphore_mem>>
    tpu.enqueue_dma source(%3 : memref<1x1024xf32, #tpu.memory_space<any>>) target(%4 : memref<1x1024xf32, #tpu.memory_space<any>>) target_semaphore(%6 : memref<!tpu.dma_semaphore, #tpu.memory_space<semaphore_mem>>)
    %c0_i32_3 = arith.constant 0 : i32
    %c0_i32_4 = arith.constant 0 : i32
    %7 = tpu.memref_slice %arg1[%2, %c0_i32_4] : memref<2x1024xf32, #tpu.memory_space<any>> -> memref<1x1024xf32, #tpu.memory_space<any>>
    %c0_i32_5 = arith.constant 0 : i32
    %8 = tpu.memref_slice %arg2[%2, %c0_i32_5] : memref<2x1024xf32, #tpu.memory_space<any>> -> memref<1x1024xf32, #tpu.memory_space<any>>
    %9 = tpu.memref_slice %arg3[%c0_i32_3] : memref<1x!tpu.dma_semaphore, #tpu.memory_space<semaphore_mem>> -> memref<1x!tpu.dma_semaphore, #tpu.memory_space<semaphore_mem>>
    %10 = tpu.memref_squeeze %9 : memref<1x!tpu.dma_semaphore, #tpu.memory_space<semaphore_mem>> -> memref<!tpu.dma_semaphore, #tpu.memory_space<semaphore_mem>>
    tpu.wait_dma2 semaphore(%10 : memref<!tpu.dma_semaphore, #tpu.memory_space<semaphore_mem>>) src(%7 : memref<1x1024xf32, #tpu.memory_space<any>>) dst(%8 : memref<1x1024xf32, #tpu.memory_space<any>>)
    return
  }
}

</mosaic_0001>

<bundles_post_ra>
// kernel: tpu_custom_call.1
= control target key start
LH: loop header
LB: loop body
LE: loop exit
PB: predicated region body
PF: predicated region fallthrough
CT: control target
= control target key end

     0   :  { %s85_s6 = smov 0   ;;  %s110_s0 = inlined_call_operand.hbm [shape: f32[2,1024], index: 0, kind: input, shape index: {}]   ;;  %s111_s1 = inlined_call_operand.hbm [shape: f32[2,1024], index: 1, kind: output, shape index: {}]  }
   0x1 LB: > { %s13_s7 = sshrl.u32 %s87_s6, 1  ;;  %s14_s8 = sand.u32 1, %s87_s6   ;;  %s87_s6 = sphi %s85_s6, %s11_s6  }
   0x2   : > { %s62_s9 = sshll.u32 %s13_s7, 4  ;;  %s89_s11 = smov 32  }
   0x3   : > { %s16_s10 = sadd.s32 %s62_s9, %s14_s8  ;;  %33 = sst [smem:[#allocation4]] %s89_s11 }
   0x4   : > { %s63_s12 = sshll.u32 %s16_s10, 4  ;;  %35 = sst [smem:[#allocation4 + $0x1]] %s89_s11 }
   0x5   : > { %s18_s15 = scalar_lea.hbm %s110_s0, %s63_s12  ;;  %s20_s18 = scalar_lea.hbm %s111_s1, %s63_s12 }
   0x6   : > { %s90_s19 = smov 1   ;;  %s91_s20 = smov [#allocation2]  }
   0x7   : > { %37 = sst [smem:[#allocation4 + $0x2]] %s90_s19  ;;  %s92_s21 = smov [#allocation3]  }
   0x8   : > { %s93_s22 = smov 0  }
   0x9   : > { %39 = dma.general %s18_s15, 128, %s20_s18, %s91_s20, %s92_s21, [#allocation4], %s93_s22, 0  }
   0xa   : > { %83 = dma.done.wait [#allocation2], 128 }
   0xb   : > { %84 = vsyncadd [#allocation2], 4294967168  ;;  %s11_s6 = sadd.s32 1, %s87_s6  }
   0xc   : > { %p8_p0 = scmp.ge.s32.totalorder %s11_s6, 2  }
   0xe   :  { %10 = sbr.rel (!%p8_p0) target bundleno = 1 (0x1), region = 23 }
  0x15   :  { %43 = vsyncmov [#allocation2] }
  0x18   :  { %s44_s23 = vpop.sfrf %43 }
  0x19   :  { %p65_p1 = scmp.ne.s32.totalorder %s44_s23, 0 }
  0x1b   :  { %48 = shalt.err (%p65_p1)  }

</bundles_post_ra>
